<compile_context>
chip_gen: v7x
topology: tpu7x:2x2x1
jax: 0.10.0
libtpu: 0.0.40
codegen_flags: <defaults>
</compile_context>

<pallas_src>
import functools

import jax
import jax.numpy as jnp
from jax.experimental import pallas as pl
from jax.experimental.pallas import tpu as pltpu

LN_EPS = 1e-5

_CompilerParams = getattr(pltpu, "CompilerParams", None) or getattr(
    pltpu, "TPUCompilerParams")


def _supports_pipeline_mode():
    if not hasattr(pl, "Buffered"):
        return False
    try:
        pl.BlockSpec((8, 128), lambda i: (i, 0), pipeline_mode=pl.Buffered(1))
        return True
    except Exception:
        return False


_HAS_BUFFERED = _supports_pipeline_mode()


def _block_spec(shape, index_map, buffers=None):
    """BlockSpec with optional explicit buffer count (falls back to default)."""
    if buffers is not None and _HAS_BUFFERED:
        return pl.BlockSpec(shape, index_map, pipeline_mode=pl.Buffered(buffers))
    return pl.BlockSpec(shape, index_map)


def _vmem_capacity_bytes():
    try:
        cap = getattr(pltpu.get_tpu_info(), "vmem_capacity_bytes", None)
        if cap:
            return int(cap)
    except Exception:
        pass
    return 64 * 2 ** 20  # v7x per-TC VMEM; safe lower bound for v5e/v6e too.


def _layernorm_bf16(gate, gamma, beta, *, dim_out, d_pad):
    """LayerNorm over the last dim (f32 statistics), result cast to bf16.

    When d_pad > dim_out the gate was zero-padded; statistics are masked so
    they are computed over the real dim_out columns only (matches torch)."""
    g = gate.astype(jnp.float32)
    if d_pad == dim_out:
        mean = jnp.mean(g, axis=-1, keepdims=True)
        c = g - mean
        var = jnp.mean(c * c, axis=-1, keepdims=True)
    else:
        mask = (jax.lax.broadcasted_iota(jnp.int32, (1, d_pad), 1)
                < dim_out).astype(jnp.float32)
        inv_n = 1.0 / float(dim_out)
        mean = jnp.sum(g * mask, axis=-1, keepdims=True) * inv_n
        c = g - mean
        cm = c * mask
        var = jnp.sum(cm * cm, axis=-1, keepdims=True) * inv_n
    y = c * jax.lax.rsqrt(var + LN_EPS) * gamma + beta
    return y.astype(jnp.bfloat16)


def _sgu_kernel(res_ref, gate_ref, w_ref, b_ref, gamma_ref, beta_ref, o_ref,
                *scratch, heads, dh, dim_out, d_pad, tm, m_axis, hoist, slice_w):
    # res_ref:   (1, tm, d_pad)  gate_ref: (1, N, d_pad)
    # w_ref:     (heads, N, N) bf16 (resident)  or  (heads, tm, N) bf16 (tiled)
    # b_ref:     (heads, tm, 1) f32   gamma/beta: (1, d_pad) f32
    # o_ref:     (1, tm, d_pad)
    gamma = gamma_ref[...]
    beta = beta_ref[...]

    if hoist:
        # Normalize the full gate once per batch (m == 0) into a persistent
        # bf16 VMEM scratch; reuse it for every m tile of this batch.
        gate_sc, = scratch

        @pl.when(pl.program_id(m_axis) == 0)
        def _():
            gate_sc[...] = _layernorm_bf16(gate_ref[0], gamma, beta,
                                           dim_out=dim_out, d_pad=d_pad)

        gate_bf = gate_sc[...]
    else:
        gate_bf = _layernorm_bf16(gate_ref[0], gamma, beta,
                                  dim_out=dim_out, d_pad=d_pad)

    res32 = res_ref[0].astype(jnp.float32)           # (tm, d_pad)
    bias32 = b_ref[...].astype(jnp.float32)          # (heads, tm, 1), lane-broadcast

    if slice_w:
        row = pl.multiple_of(pl.program_id(m_axis) * tm, tm)

    outs = []
    for h in range(heads):                            # static unroll
        if slice_w:
            w_h = w_ref[h, pl.ds(row, tm), :]         # (tm, N) rows of resident weight
        else:
            w_h = w_ref[h]                            # (tm, N) tile (or full N)
        g_h = gate_bf if heads == 1 else gate_bf[:, h * dh:(h + 1) * dh]
        out_h = jnp.dot(w_h, g_h, preferred_element_type=jnp.float32)
        outs.append(out_h + bias32[h])

    if heads == 1:
        out = outs[0]                                 # (tm, d_pad)
    else:
        pad_w = d_pad - heads * dh
        if pad_w:
            outs.append(jnp.zeros((outs[0].shape[0], pad_w), jnp.float32))
        out = jnp.concatenate(outs, axis=-1)          # single lane-dense store below

    o_ref[0] = (out * res32).astype(o_ref.dtype)


def spatial_gating_unit(x, weight, bias, gamma, beta, *, heads=1,
                        block_m=None, force_tiled_weight=False):
    """gMLP SpatialGatingUnit forward.

    x: (B, N, D). weight: (heads, N, N). bias: (heads, N).
    gamma/beta: (D // 2,) LayerNorm affine params. Returns (B, N, D // 2).
    block_m / force_tiled_weight are testing/tuning overrides."""
    B, N, D = x.shape
    dim_out = D // 2
    assert dim_out * 2 == D, "dim must be even"
    assert dim_out % heads == 0
    dh = dim_out // heads
    xb = jnp.dtype(x.dtype).itemsize

    # Lane-pad dim_out so every block is (8, 128)-tile friendly.
    d_pad = max(128, ((dim_out + 127) // 128) * 128)
    aligned = (d_pad == dim_out)

    vmem_cap = _vmem_capacity_bytes()
    budget = int(0.75 * vmem_cap)

    w_bytes = heads * N * N * 2                       # bf16 weight, fully resident
    w_buf = 1 if _HAS_BUFFERED else 2
    gate_buf = 1 if _HAS_BUFFERED else 2

    def fp_resident(t):
        n_m_ = N // max(t, 1)
        hoist_ = (n_m_ > 1 and B >= 2)
        f = w_buf * w_bytes                           # resident weight
        f += gate_buf * N * d_pad * xb                # gate slab
        f += 2 * t * d_pad * xb                       # res block (double-buffered)
        f += 2 * t * d_pad * xb                       # out block
        f += 2 * heads * t * 4                        # bias tile
        f += 2 * 2 * d_pad * 4                        # gamma, beta
        if hoist_:
            f += N * d_pad * 2                        # bf16 normalized-gate scratch
        return f

    def fp_tiled(t):
        f = 2 * heads * t * N * 2                     # streamed weight tile
        f += 2 * N * d_pad * xb                       # gate (re-fetched per step)
        f += 2 * t * d_pad * xb + 2 * t * d_pad * xb  # res + out
        f += 2 * heads * t * 4 + 2 * 2 * d_pad * 4
        return f

    def tm_candidates():
        if block_m is not None:
            assert N % block_m == 0 and (block_m == N or block_m % 8 == 0)
            return [block_m]
        c = []
        if B >= 2 or N < 16:
            c.append(N)                               # megacore comes from the B axis
        for t in (512, 256, 128):
            if t < N and N % t == 0:
                c.append(t)
        if B == 1 and N >= 16 and N % 16 == 0 and (N // 2) not in c:
            c.append(N // 2)                          # v7x: >= 2 parallel m tiles
        if N not in c:
            c.append(N)
        return c

    tm = None
    weight_resident = not force_tiled_weight
    if weight_resident:
        for t in tm_candidates():
            if fp_resident(t) <= budget:
                tm = t
                break
    if tm is None:
        weight_resident = False
        for t in tm_candidates():
            if fp_tiled(t) <= budget:
                tm = t
                break
    if tm is None:
        # Nothing fits the 75% budget: best effort with the smallest footprint.
        weight_resident = not force_tiled_weight
        fp_fn = fp_resident if weight_resident else fp_tiled
        tm = min(tm_candidates(), key=fp_fn)

    n_m = N // tm
    assert tm * n_m == N
    hoist = weight_resident and n_m > 1 and B >= 2
    slice_w = weight_resident and n_m > 1

    footprint = fp_resident(tm) if weight_resident else fp_tiled(tm)
    vmem_limit = max(footprint + (2 << 20), 32 << 20)
    vmem_limit = int(min(vmem_limit, 0.9 * vmem_cap))

    # ---- operand preparation (wrapper-side, cheap XLA ops) -------------------
    w_bf = weight.astype(jnp.bfloat16)
    bias3 = bias.reshape(heads, N, 1).astype(jnp.float32)
    gamma2 = gamma.reshape(1, dim_out).astype(jnp.float32)
    beta2 = beta.reshape(1, dim_out).astype(jnp.float32)
    if aligned:
        res_arr = gate_arr = x                        # split via BlockSpec windows
    else:
        pw = d_pad - dim_out
        gamma2 = jnp.pad(gamma2, ((0, 0), (0, pw)))
        beta2 = jnp.pad(beta2, ((0, 0), (0, pw)))
        res_arr = jnp.pad(x[..., :dim_out], ((0, 0), (0, 0), (0, pw)))
        gate_arr = jnp.pad(x[..., dim_out:], ((0, 0), (0, 0), (0, pw)))
    gate_last = 1 if aligned else 0                   # last-axis block index of gate

    # ---- grid / specs ---------------------------------------------------------
    if weight_resident:
        # Batch outer (parallel), output-row tiles inner.  Weight DMA'd once.
        grid = (B, n_m)
        m_axis = 1
        in_specs = [
            pl.BlockSpec((1, tm, d_pad), lambda b, m: (b, m, 0)),            # res
            _block_spec((1, N, d_pad), lambda b, m: (b, 0, gate_last), 1),   # gate
            _block_spec((heads, N, N), lambda b, m: (0, 0, 0), 1),           # weight
            pl.BlockSpec((heads, tm, 1), lambda b, m: (0, m, 0)),            # bias
            pl.BlockSpec((1, d_pad), lambda b, m: (0, 0)),                   # gamma
            pl.BlockSpec((1, d_pad), lambda b, m: (0, 0)),                   # beta
        ]
        out_specs = pl.BlockSpec((1, tm, d_pad), lambda b, m: (b, m, 0))
        dims = ("parallel", "arbitrary") if hoist else ("parallel", "parallel")
    else:
        # Row tiles outer so each (tm, N) weight tile is streamed from HBM
        # exactly once for the whole grid (no B x re-stream).
        grid = (n_m, B)
        m_axis = 0
        in_specs = [
            pl.BlockSpec((1, tm, d_pad), lambda m, b: (b, m, 0)),            # res
            pl.BlockSpec((1, N, d_pad), lambda m, b: (b, 0, gate_last)),     # gate
            pl.BlockSpec((heads, tm, N), lambda m, b: (0, m, 0)),            # weight
            pl.BlockSpec((heads, tm, 1), lambda m, b: (0, m, 0)),            # bias
            pl.BlockSpec((1, d_pad), lambda m, b: (0, 0)),                   # gamma
            pl.BlockSpec((1, d_pad), lambda m, b: (0, 0)),                   # beta
        ]
        out_specs = pl.BlockSpec((1, tm, d_pad), lambda m, b: (b, m, 0))
        dims = ("parallel", "parallel")

    scratch_shapes = [pltpu.VMEM((N, d_pad), jnp.bfloat16)] if hoist else []

    kernel = functools.partial(
        _sgu_kernel, heads=heads, dh=dh, dim_out=dim_out, d_pad=d_pad,
        tm=tm, m_axis=m_axis, hoist=hoist, slice_w=slice_w)

    out = pl.pallas_call(
        kernel,
        out_shape=jax.ShapeDtypeStruct((B, N, d_pad), x.dtype),
        grid=grid,
        in_specs=in_specs,
        out_specs=out_specs,
        scratch_shapes=scratch_shapes,
        compiler_params=_CompilerParams(
            dimension_semantics=dims, vmem_limit_bytes=vmem_limit),
    )(res_arr, gate_arr, w_bf, bias3, gamma2, beta2)

    if not aligned:
        out = out[..., :dim_out]
    return out


def _reference(x, weight, bias, gamma, beta, heads=1):
    # Pure-JAX reference mirroring the PyTorch forward.
    B, N, D = x.shape
    dim_out = D // 2
    res, gate = x[..., :dim_out], x[..., dim_out:]
    mean = jnp.mean(gate, axis=-1, keepdims=True)
    var = jnp.mean((gate - mean) ** 2, axis=-1, keepdims=True)
    gate = (gate - mean) / jnp.sqrt(var + LN_EPS) * gamma + beta
    dh = dim_out // heads
    gate = gate.reshape(B, N, heads, dh).transpose(0, 2, 1, 3)       # b h n d
    gate = jnp.einsum('bhnd,hmn->bhmd', gate, weight)
    gate = gate + bias[None, :, :, None]
    gate = gate.transpose(0, 2, 1, 3).reshape(B, N, dim_out)
    return gate * res


if __name__ == "__main__":
    def run_case(B, N, D, heads, **kwargs):
        dim_out = D // 2
        init_eps = 0.001 / N
        key = jax.random.PRNGKey(0)
        kx, kweight = jax.random.split(key)
        x = jax.random.normal(kx, (B, N, D), dtype=jnp.float32)
        # nn.init.uniform_(weight, -init_eps, init_eps)
        weight = jax.random.uniform(kweight, (heads, N, N), dtype=jnp.float32,
                                    minval=-init_eps, maxval=init_eps)
        bias = jnp.ones((heads, N), dtype=jnp.float32)      # self.bias = ones
        gamma = jnp.ones((dim_out,), dtype=jnp.float32)     # LayerNorm weight
        beta = jnp.zeros((dim_out,), dtype=jnp.float32)     # LayerNorm bias

        out = spatial_gating_unit(x, weight, bias, gamma, beta, heads=heads,
                                  **kwargs)
        out = jax.block_until_ready(out)
        ref = _reference(x, weight, bias, gamma, beta, heads=heads)
        assert out.shape == (B, N, dim_out)
        # bf16 matmul operands (f32 accumulation) vs f32 reference -> 1e-4 tol.
        assert jnp.allclose(out, ref, atol=1e-4, rtol=1e-4), (
            "max abs err = %g" % float(jnp.max(jnp.abs(out - ref))))

    # Small default-config case (dim=32 -> dim_out=16, dim_seq=8): padded fallback.
    run_case(B=2, N=8, D=32, heads=1)
    # Lane-aligned case (dim_out=128), 2 heads: single full-width output store.
    run_case(B=2, N=16, D=256, heads=2)
    # Multi-tile case: resident weight + LN hoist + in-kernel weight row slicing.
    run_case(B=2, N=256, D=256, heads=1, block_m=128)
    # Streamed-weight (tiled) fallback path with (n_m, B) grid ordering.
    run_case(B=2, N=256, D=256, heads=1, block_m=128, force_tiled_weight=True)
    print("KERNEL_OK")
</pallas_src>

<mosaic_0001>
module attributes {stable_mosaic.version = 11 : i64} {
  func.func @_sgu_kernel(%arg0: i32, %arg1: i32, %arg2: memref<1x8x128xf32, #tpu.memory_space<vmem>>, %arg3: memref<1x8x128xf32, #tpu.memory_space<vmem>>, %arg4: memref<1x8x8xbf16, #tpu.memory_space<vmem>>, %arg5: memref<1x8x1xf32, #tpu.memory_space<vmem>>, %arg6: memref<1x128xf32, #tpu.memory_space<vmem>>, %arg7: memref<1x128xf32, #tpu.memory_space<vmem>>, %arg8: memref<1x8x128xf32, #tpu.memory_space<vmem>>) attributes {dimension_semantics = [#tpu.dimension_semantics<parallel>, #tpu.dimension_semantics<parallel>], iteration_bounds = array<i64: 2, 1>, scalar_prefetch = 0 : i64, scratch_operands = 0 : i64, tpu.core_type = #tpu.core_type<tc>, window_params = [{transform_indices = @transform_0, window_bounds = array<i64: 1, 8, 128>}, {pipeline_mode = #tpu.pipeline_mode<synchronous>, transform_indices = @transform_1, window_bounds = array<i64: 1, 8, 128>}, {pipeline_mode = #tpu.pipeline_mode<synchronous>, transform_indices = @transform_2, window_bounds = array<i64: 1, 8, 8>}, {transform_indices = @transform_3, window_bounds = array<i64: 1, 8, 1>}, {pipeline_mode = #tpu.pipeline_mode<synchronous>, transform_indices = @transform_4, window_bounds = array<i64: 1, 128>}, {pipeline_mode = #tpu.pipeline_mode<synchronous>, transform_indices = @transform_5, window_bounds = array<i64: 1, 128>}, {transform_indices = @transform_6, window_bounds = array<i64: 1, 8, 128>}]} {
    %c0 = arith.constant 0 : index
    %c0_0 = arith.constant 0 : index
    %0 = vector.load %arg6[%c0, %c0_0] : memref<1x128xf32, #tpu.memory_space<vmem>>, vector<1x128xf32>
    %c0_1 = arith.constant 0 : index
    %c0_2 = arith.constant 0 : index
    %1 = vector.load %arg7[%c0_1, %c0_2] : memref<1x128xf32, #tpu.memory_space<vmem>>, vector<1x128xf32>
    %c0_3 = arith.constant 0 : index
    %c0_4 = arith.constant 0 : index
    %c0_5 = arith.constant 0 : index
    %2 = vector.load %arg3[%c0_3, %c0_4, %c0_5] : memref<1x8x128xf32, #tpu.memory_space<vmem>>, vector<1x8x128xf32>
    %3 = vector.shape_cast %2 : vector<1x8x128xf32> to vector<8x128xf32>
    %4 = tpu.iota {dimensions = array<i32: 1>} : vector<1x128xi32>
    %c16_i32 = arith.constant 16 : i32
    %5 = vector.broadcast %c16_i32 : i32 to vector<1x128xi32>
    %6 = arith.cmpi slt, %4, %5 : vector<1x128xi32>
    %7 = arith.extui %6 : vector<1x128xi1> to vector<1x128xi32>
    %8 = arith.sitofp %7 : vector<1x128xi32> to vector<1x128xf32>
    %9 = vector.broadcast %8 : vector<1x128xf32> to vector<8x128xf32>
    %10 = arith.mulf %3, %9 : vector<8x128xf32>
    %cst = arith.constant dense<0.000000e+00> : vector<8xf32>
    %11 = vector.multi_reduction <add>, %10, %cst [1] : vector<8x128xf32> to vector<8xf32>
    %12 = vector.shape_cast %11 : vector<8xf32> to vector<8x1xf32>
    %cst_6 = arith.constant 6.250000e-02 : f32
    %13 = vector.broadcast %cst_6 : f32 to vector<8x1xf32>
    %14 = arith.mulf %12, %13 : vector<8x1xf32>
    %15 = vector.broadcast %14 : vector<8x1xf32> to vector<8x128xf32>
    %16 = arith.subf %3, %15 : vector<8x128xf32>
    %17 = vector.broadcast %8 : vector<1x128xf32> to vector<8x128xf32>
    %18 = arith.mulf %16, %17 : vector<8x128xf32>
    %19 = arith.mulf %18, %18 : vector<8x128xf32>
    %cst_7 = arith.constant dense<0.000000e+00> : vector<8xf32>
    %20 = vector.multi_reduction <add>, %19, %cst_7 [1] : vector<8x128xf32> to vector<8xf32>
    %21 = vector.shape_cast %20 : vector<8xf32> to vector<8x1xf32>
    %cst_8 = arith.constant 6.250000e-02 : f32
    %22 = vector.broadcast %cst_8 : f32 to vector<8x1xf32>
    %23 = arith.mulf %21, %22 : vector<8x1xf32>
    %cst_9 = arith.constant 9.99999974E-6 : f32
    %24 = vector.broadcast %cst_9 : f32 to vector<8x1xf32>
    %25 = arith.addf %23, %24 : vector<8x1xf32>
    %26 = math.rsqrt %25 : vector<8x1xf32>
    %27 = vector.broadcast %26 : vector<8x1xf32> to vector<8x128xf32>
    %28 = arith.mulf %16, %27 : vector<8x128xf32>
    %29 = vector.broadcast %0 : vector<1x128xf32> to vector<8x128xf32>
    %30 = arith.mulf %28, %29 : vector<8x128xf32>
    %31 = vector.broadcast %1 : vector<1x128xf32> to vector<8x128xf32>
    %32 = arith.addf %30, %31 : vector<8x128xf32>
    %33 = arith.truncf %32 : vector<8x128xf32> to vector<8x128xbf16>
    %c0_10 = arith.constant 0 : index
    %c0_11 = arith.constant 0 : index
    %c0_12 = arith.constant 0 : index
    %34 = vector.load %arg2[%c0_10, %c0_11, %c0_12] : memref<1x8x128xf32, #tpu.memory_space<vmem>>, vector<1x8x128xf32>
    %35 = vector.shape_cast %34 : vector<1x8x128xf32> to vector<8x128xf32>
    %c0_13 = arith.constant 0 : index
    %c0_14 = arith.constant 0 : index
    %c0_15 = arith.constant 0 : index
    %36 = vector.load %arg5[%c0_13, %c0_14, %c0_15] : memref<1x8x1xf32, #tpu.memory_space<vmem>>, vector<1x8x1xf32>
    %c0_16 = arith.constant 0 : index
    %c0_17 = arith.constant 0 : index
    %c0_18 = arith.constant 0 : index
    %37 = vector.load %arg4[%c0_16, %c0_17, %c0_18] : memref<1x8x8xbf16, #tpu.memory_space<vmem>>, vector<1x8x8xbf16>
    %38 = vector.shape_cast %37 : vector<1x8x8xbf16> to vector<8x8xbf16>
    %cst_19 = arith.constant dense<0.000000e+00> : vector<8x128xf32>
    %39 = tpu.matmul %38, %33, %cst_19 {dimension_numbers = #tpu.dot_dimension_numbers<[1], [0], [0], [1], [0, 0, 1, 1], [], []>} : vector<8x8xbf16>, vector<8x128xbf16>, vector<8x128xf32> -> vector<8x128xf32>
    %40 = vector.shape_cast %36 : vector<1x8x1xf32> to vector<8x1xf32>
    %41 = vector.broadcast %40 : vector<8x1xf32> to vector<8x128xf32>
    %42 = arith.addf %39, %41 : vector<8x128xf32>
    %43 = arith.mulf %42, %35 : vector<8x128xf32>
    %c0_20 = arith.constant 0 : index
    %c0_21 = arith.constant 0 : index
    %c0_22 = arith.constant 0 : index
    %44 = vector.load %arg8[%c0_20, %c0_21, %c0_22] : memref<1x8x128xf32, #tpu.memory_space<vmem>>, vector<1x8x128xf32>
    %45 = vector.shape_cast %44 : vector<1x8x128xf32> to vector<8x128xf32>
    %46 = vector.shape_cast %43 : vector<8x128xf32> to vector<1x8x128xf32>
    tpu.vector_store %arg8[%c0_20, %c0_21, %c0_22], %46 {strides = array<i32>} : memref<1x8x128xf32, #tpu.memory_space<vmem>>, vector<1x8x128xf32>,
    return
  }
  func.func @transform_0(%arg0: i32, %arg1: i32) -> (i32, i32, i32) {
    %c0_i32 = arith.constant 0 : i32
    %c0_i32_0 = arith.constant 0 : i32
    return %arg0, %arg1, %c0_i32 : i32, i32, i32
  }
  func.func @transform_1(%arg0: i32, %arg1: i32) -> (i32, i32, i32) {
    %c0_i32 = arith.constant 0 : i32
    %c0_i32_0 = arith.constant 0 : i32
    %c0_i32_1 = arith.constant 0 : i32
    return %arg0, %c0_i32, %c0_i32_0 : i32, i32, i32
  }
  func.func @transform_2(%arg0: i32, %arg1: i32) -> (i32, i32, i32) {
    %c0_i32 = arith.constant 0 : i32
    %c0_i32_0 = arith.constant 0 : i32
    %c0_i32_1 = arith.constant 0 : i32
    %c0_i32_2 = arith.constant 0 : i32
    return %c0_i32, %c0_i32_0, %c0_i32_1 : i32, i32, i32
  }
  func.func @transform_3(%arg0: i32, %arg1: i32) -> (i32, i32, i32) {
    %c0_i32 = arith.constant 0 : i32
    %c0_i32_0 = arith.constant 0 : i32
    %c0_i32_1 = arith.constant 0 : i32
    return %c0_i32, %arg1, %c0_i32_0 : i32, i32, i32
  }
  func.func @transform_4(%arg0: i32, %arg1: i32) -> (i32, i32) {
    %c0_i32 = arith.constant 0 : i32
    %c0_i32_0 = arith.constant 0 : i32
    %c0_i32_1 = arith.constant 0 : i32
    return %c0_i32, %c0_i32_0 : i32, i32
  }
  func.func @transform_5(%arg0: i32, %arg1: i32) -> (i32, i32) {
    %c0_i32 = arith.constant 0 : i32
    %c0_i32_0 = arith.constant 0 : i32
    %c0_i32_1 = arith.constant 0 : i32
    return %c0_i32, %c0_i32_0 : i32, i32
  }
  func.func @transform_6(%arg0: i32, %arg1: i32) -> (i32, i32, i32) {
    %c0_i32 = arith.constant 0 : i32
    %c0_i32_0 = arith.constant 0 : i32
    return %arg0, %arg1, %c0_i32 : i32, i32, i32
  }
}

</mosaic_0001>

<bundles_post_ra>
// kernel: tpu_custom_call.1
= control target key start
LH: loop header
LB: loop body
LE: loop exit
PB: predicated region body
PF: predicated region fallthrough
CT: control target
= control target key end

     0   :  { %11 = vsyncpa [#allocation3], 0  ;;  %s1071_s0 = inlined_call_operand.hbm [shape: f32[2,8,128], index: 0, kind: input, shape index: {}]   ;;  %s1072_s1 = inlined_call_operand.hbm [shape: f32[2,8,128], index: 1, kind: input, shape index: {}]   ;;  %s1073_s2 = inlined_call_operand.vmem [shape: bf16[1,8,8], index: 2, kind: input, shape index: {}]   ;;  %s1074_s3 = inlined_call_operand.vmem [shape: f32[1,8,1], index: 3, kind: input, shape index: {}]   ;;  %s1075_s4 = inlined_call_operand.vmem [shape: f32[1,128], index: 4, kind: input, shape index: {}]   ;;  %s1076_s5 = inlined_call_operand.vmem [shape: f32[1,128], index: 5, kind: input, shape index: {}]   ;;  %s1077_s6 = inlined_call_operand.hbm [shape: f32[2,8,128], index: 6, kind: output, shape index: {}]  }
   0x1   :  { %13 = vsyncpa [#allocation3 + $0x1], 0 }
   0x2   :  { %14 = vsyncpa [#allocation6], 0 }
   0x3   :  { %15 = vsyncpa [#allocation4], 0 }
   0x4   :  { %17 = vsyncpa [#allocation4 + $0x1], 0  ;;  %s830_s21 = smov 0   ;;  %s832_s22 = smov 0  }
   0x5   :  { %s834_s23 = smov 0   ;;  %s836_s24 = smov 0  }
   0x6   :  { %s838_s25 = smov 0   ;;  %s840_s26 = smov 0  }
   0x7 LB: > { %s538_s27 = sadd.s32 4294967295, %s787_s26   ;;  %s539_s28 = sadd.s32 4294967294, %s787_s26   ;;  %s787_s26 = sphi %s840_s26, %s23_s26   ;;  %s783_s25 = sphi %s838_s25, %s1099_s25   ;;  %s779_s24 = sphi %s836_s24, %s1098_s24   ;;  %s775_s23 = sphi %s834_s23, %s1097_s23   ;;  %s771_s22 = sphi %s832_s22, %s1096_s22   ;;  %s767_s21 = sphi %s830_s21, %s1095_s21  }
   0x8   : > { %p57_p0 = scmp.ne.s32.totalorder %s771_s22, %s767_s21  ;;  %p58_p1 = scmp.eq.s32.totalorder %s538_s27, 0 }
   0x9   : > { %p864_p2 = scmp.eq.s32.totalorder %s538_s27, 1  ;;  %p204_p3 = scmp.eq.s32.totalorder %s539_s28, 1 }
   0xa   : > { %p868_p4 = por %p58_p1, %p57_p0  ;;  %p540_p5 = scmp.ge.s32.totalorder %s787_s26, 1 }
   0xb   : > { %s1081_s29 = scalar_select %p864_p2, 1, 0 }
   0xc   : > { %s1082_s30 = scalar_select %p868_p4, 1, 0 }
   0xd   : > { %p873_p6 = por %p204_p3, %p57_p0  ;;  %p211_p7 = scmp.lt.s32.totalorder %s787_s26, 3 }
   0xe   : > { %s541_s8 = sshll.u32 %s779_s24, 7  ;;  %s789_s13 = smov [#allocation5]  }
   0xf   : > { %s1083_s7 = scalar_select %p873_p6, 1, 0 }
  0x10   : > { %p879_p8 = pnand %p540_p5, %p211_p7  ;;  %s888_s12 = scalar_lea.hbm %s1072_s1, %s541_s8 }
  0x11   : > { %s226_s14 = sshll.u32 %s789_s13, 4  ;;  %s35_s16 = sadd.s32 1, %s783_s25  ;;  %s227_s14 = int_to_ptr.vmem [resolvable:$true] %s226_s14 }
  0x12   : > { %s1084_s9 = scalar_select %p879_p8, 1, 0 }
  0x13   : > { %p571_p10 = pneg %p879_p8  ;;  %p900_p12 = scmp.ge.s32.totalorder %s35_s16, 2 }
  0x14   : > { %s641_s18 = scalar_lea.hbm %s888_s12, 128  ;;  %s646_s27 = scalar_lea.hbm %s1072_s1, 256 }
  0x15   : > { %p895_p11 = pnand %p571_p10, %p868_p4  ;;  %p642_p13 = scmp.ne.s32.totalorder %s888_s12, %s641_s18 }
  0x16   : > { %s1086_s17 = scalar_select %p900_p12, 1, 0 }
  0x17   : > { %p643_p0 = pneg %p895_p11  ;;  %p647_p5 = scmp.lt.u32.totalorder %s888_s12, %s1072_s1 }
  0x18   : > { %p648_p7 = scmp.lt.u32.totalorder %s646_s27, %s641_s18  ;;  %p650_p9 = scmp.lt.u32.totalorder %s641_s18, %s888_s12 }
  0x19   : > { %p644_p1 = pnand %p643_p0, %p642_p13 }
  0x1a   : > { %p649_p10 = por %p648_p7, %p647_p5 }
  0x1b   : > { %p645_p3 = pneg %p644_p1 }
  0x1c   : > { %p651_p6 = por %p650_p9, %p649_p10 }
  0x1e   : > { %p652_p4 = pnand %p651_p6, %p645_p3 }
  0x20   : > { %655 = shalt.err (!%p652_p4)
}
  0x21   : > { %s656_s11 = scalar_lea.vmem %s227_s14, 128  ;;  %p664_p2 = scmp.lt.s32.totalorder %s227_s14, %s227_s14 }
  0x22   : > { %p657_p8 = scmp.ne.s32.totalorder %s227_s14, %s656_s11  ;;  %p665_p12 = scmp.lt.s32.totalorder %s656_s11, %s656_s11 }
  0x24   : > { %p659_p13 = pnand %p657_p8, %p643_p0  ;;  %p666_p5 = por %p665_p12, %p664_p2 }
  0x26   : > { %p660_p1 = pneg %p659_p13 }
  0x28   : > { %p667_p7 = pnand %p666_p5, %p660_p1 }
  0x2a   : > { %670 = shalt.err (!%p667_p7)
}
  0x2b   : > { %574 = dma.hbm_to_vmem [thread:$0]  (!%p895_p11), %s888_s12, 128, %s227_s14, [#allocation6]  }
  0x2c   : > { %p1087_p4 = scmp.ne.s32.totalorder %s1086_s17, 0  ;;  %s44_s13 = sadd.s32 1, %s775_s23 }
  0x2d   : > { %p51_p2 = scmp.ne.s32.totalorder %s775_s23, %s771_s22  ;;  %p52_p6 = scmp.eq.s32.totalorder %s787_s26, 0 }
  0x2e   : > { %s1101_s16 = smov (%p1087_p4, %s35_s16), 0  ;;  %p1088_p9 = scmp.ne.s32.totalorder %s1081_s29, 0 }
  0x2f   : > { %s39_s15 = ssub.s32 %s783_s25, %s1101_s16  ;;  %p53_p0 = por %p52_p6, %p51_p2 }
  0x30   : > { %p42_p8 = scmp.eq.s32.totalorder %s39_s15, 0  ;;  %p937_p12 = por %p1088_p9, %p51_p2 }
  0x31   : > { %p583_p3 = scmp.lt.s32.totalorder %s787_s26, 2  ;;  %s253_s20 = sand.u32 1, %s775_s23  }
  0x32   : > { %s943_s19 = scalar_select %p42_p8, %s775_s23, %s44_s13  }
  0x33   : > { %s545_s12 = sshll.u32 %s783_s25, 7  ;;  %s544_s14 = sshll.u32 %s253_s20, 3 }
  0x34   : > { %s950_s28 = scalar_lea.hbm %s1071_s0, %s545_s12  ;;  %s257_s29 = scalar_lea.vmem [#allocation2], %s544_s14 }
  0x35   : > { %s265_s10 = sshll.u32 %s257_s29, 4  ;;  %p952_p11 = pnand %p583_p3, %p53_p0  ;;  %s956_s10 = int_to_ptr.vmem [resolvable:$true] %s265_s10 }
  0x36   : > { %s254_s13 = scalar_lea.sflag [#allocation3], %s253_s20  ;;  %s671_s15 = scalar_lea.hbm %s950_s28, 128 }
  0x37   : > { %p672_p10 = scmp.ne.s32.totalorder %s950_s28, %s671_s15  ;;  %p673_p13 = pneg %p952_p11 }
  0x38   : > { %s676_s17 = scalar_lea.hbm %s1071_s0, 256  ;;  %p677_p7 = scmp.lt.u32.totalorder %s950_s28, %s1071_s0 }
  0x39   : > { %p674_p1 = pnand %p673_p13, %p672_p10  ;;  %p678_p4 = scmp.lt.u32.totalorder %s676_s17, %s671_s15 }
  0x3a   : > { %p680_p6 = scmp.lt.u32.totalorder %s671_s15, %s950_s28 }
  0x3b   : > { %p675_p5 = pneg %p674_p1  ;;  %p679_p2 = por %p678_p4, %p677_p7 }
  0x3d   : > { %p681_p8 = por %p680_p6, %p679_p2 }
  0x3f   : > { %p682_p9 = pnand %p681_p8, %p675_p5 }
  0x41   : > { %685 = shalt.err (!%p682_p9)
}
  0x42   : > { %s686_s20 = scalar_lea.vmem %s956_s10, 128  ;;  %s790_s12 = smov [#allocation2]  }
  0x43   : > { %p687_p0 = scmp.ne.s32.totalorder %s956_s10, %s686_s20  ;;  %s691_s14 = sshll.u32 %s790_s12, 4  ;;  %s692_s14 = int_to_ptr.vmem [resolvable:$false] %s691_s14 }
  0x44   : > { %s693_s27 = scalar_lea.vmem %s692_s14, 256  ;;  %p694_p1 = scmp.lt.s32.totalorder %s956_s10, %s692_s14 }
  0x45   : > { %p689_p3 = pnand %p687_p0, %p673_p13  ;;  %p695_p7 = scmp.lt.s32.totalorder %s693_s27, %s686_s20 }
  0x47   : > { %p690_p10 = pneg %p689_p3  ;;  %p696_p4 = por %p695_p7, %p694_p1 }
  0x49   : > { %p697_p2 = pnand %p696_p4, %p690_p10 }
  0x4b   : > { %700 = shalt.err (!%p697_p2)
}
  0x4c   : > { %578 = dma.hbm_to_vmem [thread:$0]  (!%p952_p11), %s950_s28, 128, %s956_s10, %s254_s13  }
  0x4d   : > { %p1091_p5 = scmp.ne.s32.totalorder %s1084_s9, 0 }
  0x4e   : > { %s986_s15 = sand.u32 (!%p1091_p5), 1, %s771_s22   ;;  %p1092_p13 = scmp.ne.s32.totalorder (!%p1091_p5), %s1082_s30, 0 }
  0x4f   : > { %274 = sbr.rel (%p1091_p5) target bundleno = 646 (0x286), region = 44  ;;  %s547_s17 = sshll.u32 (!%p1091_p5), %s986_s15, 3 }
  0x50   : > { %s277_s29 = scalar_lea.sflag (!%p1091_p5), [#allocation3], %s986_s15  ;;  %s992_s20 = scalar_lea.vmem (!%p1091_p5), [#allocation2], %s547_s17 }
  0x56   : > { %754 = dma.done.wait (%p1092_p13), %s277_s29, 128  }
  0x57   : > { %756 = vsyncadd (%p1092_p13), %s277_s29, 4294967168 }
  0x58   : > { %758 = dma.done.wait (%p1092_p13), [#allocation6], 128  }
  0x59   : > { %760 = vsyncadd (%p1092_p13), [#allocation6], 4294967168  ;;  %v325_v0 = vlaneseq  ;;  %v791_v1 = vmov 0.0   ;;  %v324_v4 = vld [vmem:[#allocation5] sm:$0xff]  ;;  %vm792_vm1 = vmmov 0   ;;  %v359_v11 = vld [vmem:[%s1074_s3] sm:$0xff]  ;;  %s1022_s28 = scalar_lea.hbm %s1077_s6, %s541_s8 }
  0x5a   : > { %559 = vmatprep.subr.bf16.mxu0 %v791_v1  ;;  %561 = vmatprep.mubr.msk.bf16.mxu0 %vm792_vm1, %v791_v1  ;;  %v793_v12 = vmov 0   ;;  %v550_v17 = vld [vmem:[%s1075_s4] ss:$0 sm:$0xff]  ;;  %vm370_vm2 = vcmask 1043456   ;;  %vm366_vm3 = vcmask 64512   ;;  %s316_s27 = scalar_lea.vmem [#allocation7], %s547_s17 }
  0x5b   : > { %v326_v2 = vand.u32 127, %v325_v0  ;;  %637 = vset.pattern.permute.xlu1 %v793_v12  ;;  %638 = vset.pattern.permute.xlu0 %v793_v12  ;;  %v551_v19 = vld [vmem:[%s1076_s5] ss:$0 sm:$0xff]  ;;  %s431_s29 = sshll.u32 %s316_s27, 4  ;;  %s794_s10 = smov [#allocation7]   ;;  %s1024_s29 = int_to_ptr.vmem [resolvable:$true] %s431_s29 }
  0x5c   : > { %363 = vperm.xlu1 %637, %v359_v11   ;;  %v360_v24 = vld [vmem:[%s1073_s2] sm:$0xf]  ;;  %s701_s17 = scalar_lea.vmem %s1024_s29, 128  ;;  %s705_s11 = sshll.u32 %s794_s10, 4  ;;  %s706_s11 = int_to_ptr.vmem [resolvable:$false] %s705_s11 }
  0x5d   : > { %vm327_vm0 = vcmp.lt.s32.totalorder %v326_v2, 16  ;;  %v358_v26 = vld [vmem:[%s992_s20] sm:$0xff]  ;;  %s417_s20 = scalar_lea.sflag [#allocation4], %s986_s15  ;;  %p702_p11 = scmp.ne.s32.totalorder %s1024_s29, %s701_s17 }
  0x5e   : > { %v549_v3 = vsel %vm327_vm0, 1.0, %v791_v1  ;;  %s707_s24 = scalar_lea.vmem %s706_s11, 256  ;;  %p708_p9 = scmp.lt.s32.totalorder %s1024_s29, %s706_s11 }
  0x5f   : > { %v330_v5 = vmul.f32 %v549_v3, %v324_v4  ;;  %p703_p6 = pnand %p702_p11, %p937_p12  ;;  %p709_p0 = scmp.lt.s32.totalorder %s707_s24, %s701_s17 }
  0x61   : > { %331 = vadd.xlane.f32.xlu0 %v330_v5  ;;  %p704_p8 = pneg %p703_p6  ;;  %p710_p3 = por %p709_p0, %p708_p9 }
  0x63   : > { %p711_p10 = pnand %p710_p3, %p704_p8 }
  0xdb   : > { %v364_v25 = vpop.permute.xlu1 %363 }
  0xee   : > { %v332_v6 = vpop.xlane.xlu0 %331 }
  0xef   : > { %v333_v7 = vmul.f32 0.0625, %v332_v6 }
  0xf1   : > { %v334_v8 = vsub.f32 %v324_v4, %v333_v7 }
  0xf3   : > { %v335_v9 = vmul.f32 %v549_v3, %v334_v8 }
  0xf5   : > { %v336_v10 = vmul.f32 %v335_v9, %v335_v9 }
  0xf7   : > { %337 = vadd.xlane.f32.xlu0 %v336_v10 }
 0x184   : > { %v338_v13 = vpop.xlane.xlu0 %337 }
 0x185   : > { %v339_v14 = vmul.f32 0.0625, %v338_v13 }
 0x187   : > { %v340_v15 = vadd.f32 1e-05, %v339_v14 }
 0x189   : > { %639 = vrsqrt.f32 %v340_v15 }
 0x193   : > { %v640_v16 = vpop.eup %639 }
 0x194   : > { %v342_v18 = vmul.f32 %v640_v16, %v334_v8 }
 0x196   : > { %v349_v20 = vmul.f32 %v550_v17, %v342_v18 }
 0x198   : > { %v356_v21 = vadd.f32 %v551_v19, %v349_v20 }
 0x19a   : > { %v357_v22 = vpack.c.bf16 %v356_v21, %v356_v21 }
 0x19c   : > { %v372_v23 = vsel %vm370_vm2, %v357_v22, 0 }
 0x19d   : > { %560 = vmatpush3.bf16.msra.mxu0 %v372_v23 }
 0x1a0   : > { %562 = vmatmul.mubr.msk.bf16.vlgmr.msra.gmra.mrb[0].mxu0 %vm366_vm3, %v360_v24 }
 0x273   : > { %v408_v27 = vpop.f32.mrb[0].mxu0 }
 0x274   : > { %v409_v28 = vadd.f32 %v408_v27, %v364_v25  ;;  %v563_v29 = vpop.f32.mrb[1].mxu0 }
 0x275   : > { %v411_v30 = vpop.f32.mrb[2].mxu0 }
 0x276   : > { %v414_v31 = vmul.f32 %v409_v28, %v358_v26  ;;  %v564_v32 = vpop.f32.mrb[3].mxu0 }
 0x278   : > { %415 = vst [vmem:[%s316_s27] sm:$0xff] %v414_v31 }
 0x279   : > { %714 = shalt.err (!%p711_p10)
}
 0x27a   : > { %s715_s8 = scalar_lea.hbm %s1022_s28, 128  ;;  %s719_s12 = scalar_lea.hbm %s1077_s6, 256 }
 0x27b   : > { %p716_p1 = scmp.ne.s32.totalorder %s1022_s28, %s715_s8  ;;  %p720_p2 = scmp.lt.u32.totalorder %s1022_s28, %s1077_s6 }
 0x27c   : > { %p721_p5 = scmp.lt.u32.totalorder %s719_s12, %s715_s8  ;;  %p723_p11 = scmp.lt.u32.totalorder %s715_s8, %s1022_s28 }
 0x27d   : > { %p717_p7 = pnand %p716_p1, %p937_p12 }
 0x27e   : > { %p722_p13 = por %p721_p5, %p720_p2 }
 0x27f   : > { %p718_p4 = pneg %p717_p7 }
 0x280   : > { %p724_p6 = por %p723_p11, %p722_p13 }
 0x282   : > { %p725_p8 = pnand %p724_p6, %p718_p4 }
 0x284   : > { %728 = shalt.err (!%p725_p8)
}
 0x285   : > { %569 = dma.vmem_to_hbm [thread:$0]  (%p937_p12), %s1024_s29, 128, %s1022_s28, %s417_s20  }
 0x286 PF: > { %s443_s9 = sand.u32 1, %s767_s21   ;;  %p1093_p9 = scmp.ne.s32.totalorder %s1083_s7, 0 }
 0x287   : > { %p1094_p0 = scmp.ge.s32.totalorder %s787_s26, 2  ;;  %s444_s30 = scalar_lea.sflag [#allocation4], %s443_s9 }
 0x289   : > { %p580_p3 = pnand %p1094_p0, %p1093_p9 }
 0x28b   : > { %762 = dma.done.wait (!%p580_p3), %s444_s30, 128  }
 0x28c   : > { %764 = vsyncadd (!%p580_p3), %s444_s30, 4294967168  ;;  %s23_s26 = sadd.s32 1, %s787_s26   ;;  %s1095_s21 = smov %s771_s22 }
 0x28d   : > { %p20_p10 = scmp.ge.s32.totalorder %s23_s26, 4   ;;  %s1096_s22 = smov %s775_s23 }
 0x28e   : > { %s1097_s23 = smov %s943_s19  ;;  %s1098_s24 = smov %s783_s25 }
 0x28f   : > { %s1099_s25 = smov %s1101_s16  ;;  %22 = sbr.rel (!%p20_p10) target bundleno = 7 (0x7), region = 97 }
 0x296   :  { %449 = vsyncpa [#allocation3], 1 }
 0x297   :  { %451 = vsyncpa [#allocation3 + $0x1], 1 }
 0x298   :  { %452 = vsyncpa [#allocation6], 1 }
 0x299   :  { %453 = vsyncpa [#allocation4], 1 }
 0x29a   :  { %455 = vsyncpa [#allocation4 + $0x1], 1 }

</bundles_post_ra>
